<compile_context>
chip_gen: v6e
topology: v6e:2x2x1
jax: 0.10.0
libtpu: 0.0.40
codegen_flags: <defaults>
</compile_context>

<pallas_src>
import functools
import math

import numpy as np

import jax
import jax.numpy as jnp
from jax import lax
from jax.experimental import pallas as pl
from jax.experimental.pallas import tpu as pltpu


_TARGET_BLOCK_BYTES = 6 << 20   # padded bytes per block (v7x wants 6-8 MiB)
_VMEM_LIMIT_BYTES = 48 << 20    # 2 arrays x 2 buffers x ~6 MiB = 24 MiB << 48


# ------------------------- exact small-integer f32 math ----------------------


def _floor_div_f32(v, q):
    # Exact floor(v / q) for integer-valued f32 v, q with 0 <= v < 2**22 and
    # q >= 1: the +0.5 keeps the exact quotient at least 0.5/q away from the
    # next integer, which dominates the f32 rounding error in that range.
    # All operands in this kernel are < a few thousand by construction.
    return jnp.floor((v + 0.5) / q)


def _mod_f32(v, q):
    return v - _floor_div_f32(v, q) * q


# ----------------------------- Pallas kernel --------------------------------


def _gridmask_kernel(params_ref, x_ref, o_ref, *, hf, hr, w, off_h, off_w,
                     mode, sub_tile, lane_extent):
    """out = x * gridmask for one (sample, sublane-tile) block.

    params_ref : SMEM int32 (5*N,) -> [d, st_h, st_w, l, skip] per sample.
    x_ref/o_ref: VMEM (1, sub_tile, lane_extent) block of (N, C*Hf, Hr*W).
    Row s maps to (channel = s // Hf, hf = s % Hf); lane p maps to
    (hr = p // W, w = p % W); the image row is h = hf*Hr + hr.
    """
    n = pl.program_id(0)
    js = pl.program_id(1)

    base = n * 5
    d = params_ref[base]
    st_h = params_ref[base + 1]
    st_w = params_ref[base + 2]
    l = params_ref[base + 3]
    skip = params_ref[base + 4]

    d_f = d.astype(jnp.float32)
    l_f = l.astype(jnp.float32)
    st_h_f = st_h.astype(jnp.float32)
    st_w_f = st_w.astype(jnp.float32)

    # --- sublane-only index math, shape (1, sub_tile, 1): tiny EUP work ------
    r = lax.broadcasted_iota(jnp.int32, (1, sub_tile, 1), 1).astype(jnp.float32)
    s = (js * sub_tile).astype(jnp.float32) + r          # global row in C*Hf
    hf_idx = _mod_f32(s, float(hf)) if hf > 1 else jnp.zeros_like(s)
    # (sublane part of y + off_h + d - st_h) mod d, in [0, d)
    a_y = _mod_f32(hf_idx * float(hr) + float(off_h) + d_f - st_h_f, d_f)

    # --- lane-only index math, shape (1, 1, lane_extent): tiny EUP work ------
    p = lax.broadcasted_iota(jnp.int32, (1, 1, lane_extent), 2).astype(jnp.float32)
    if hr > 1:
        hr_idx = _floor_div_f32(p, float(w))             # values < Hr
        w_idx = p - hr_idx * float(w)                    # values < W
        b_y = _mod_f32(hr_idx, d_f)                      # in [0, d)
    else:
        hr_idx = jnp.zeros_like(p)
        w_idx = p
        b_y = jnp.zeros_like(p)
    x_band = _mod_f32(w_idx + float(off_w) + d_f - st_w_f, d_f) < l_f

    # --- full-block mask: VPU add/compare/select only (no full-size divide) --
    y_mod = a_y + b_y                                    # in [0, 2d)
    y_mod = jnp.where(y_mod >= d_f, y_mod - d_f, y_mod)  # (1, sub_tile, lane)
    y_band = y_mod < l_f
    zeroed = jnp.logical_or(y_band, x_band)
    keep = zeroed if mode == 1 else jnp.logical_not(zeroed)
    mask = keep.astype(x_ref.dtype)
    # prob-skip: identity (unmasked) output regardless of mode.
    mask = jnp.where(skip != 0, jnp.ones_like(mask), mask)

    o_ref[...] = x_ref[...] * mask


# --------------------------- layout / tiling plan ----------------------------


def _plan_fold(h, w):
    """Pick H = Hf*Hr so the (N, C*Hf, Hr*W) reshape is sublane+lane dense.

    Prefer the smallest divisor Hr of H with (Hr*W) % 128 == 0 (lane axis a
    multiple of 128 -> unmasked full-width stores; in-kernel divides stay on
    values < Hr*W).  If no such divisor exists, fold the whole image into the
    lane axis when it is small enough for exact f32 index math; otherwise fall
    back to Hr=1 (lane = W as a full-extent block dim).
    Returns (Hf, Hr).
    """
    for cand in range(1, h + 1):
        if h % cand == 0 and (cand * w) % 128 == 0:
            return h // cand, cand
    if h * w <= (1 << 17):
        return 1, h
    # TODO(synk): rare shapes (odd dims, very large images) fall back to
    # lane = W, which may use partial-width stores.
    return h, 1


def _choose_sub_tile(sub_extent, lane_extent, itemsize, n_samples):
    """Sublane rows per block, budgeted with PADDED tile sizes."""
    quantum = max(8, 32 // max(1, itemsize))     # 8 f32 / 16 bf16 / 32 int8
    lane_padded = pl.cdiv(lane_extent, 128) * 128
    row_bytes = lane_padded * itemsize
    max_rows = max(quantum,
                   (_TARGET_BLOCK_BYTES // row_bytes) // quantum * quantum)
    st = sub_extent if sub_extent <= max_rows else max_rows
    # v7x load balance: make sure both TensorCores get at least one grid step.
    if n_samples * pl.cdiv(sub_extent, st) < 2 and sub_extent >= 2 * quantum:
        st = pl.cdiv(pl.cdiv(sub_extent, 2), quantum) * quantum
    return int(st)


@functools.lru_cache(maxsize=None)
def _build_gridmask_call(n, c, h, w, dtype_str, mode):
    dtype = np.dtype(dtype_str)
    hf, hr = _plan_fold(h, w)
    sub_extent = c * hf
    lane_extent = hr * w
    hh = math.ceil(math.sqrt(h * h + w * w))
    off_h = (hh - h) // 2
    off_w = (hh - w) // 2
    sub_tile = _choose_sub_tile(sub_extent, lane_extent, dtype.itemsize, n)
    sub_blocks = pl.cdiv(sub_extent, sub_tile)

    kernel = functools.partial(
        _gridmask_kernel, hf=hf, hr=hr, w=w, off_h=off_h, off_w=off_w,
        mode=mode, sub_tile=sub_tile, lane_extent=lane_extent)

    nbytes = n * c * h * w * dtype.itemsize
    call = pl.pallas_call(
        kernel,
        out_shape=jax.ShapeDtypeStruct((n, sub_extent, lane_extent), dtype),
        grid_spec=pltpu.PrefetchScalarGridSpec(
            num_scalar_prefetch=1,
            grid=(n, sub_blocks),
            in_specs=[pl.BlockSpec((1, sub_tile, lane_extent),
                                   lambda i, j, prm: (i, j, 0))],
            out_specs=pl.BlockSpec((1, sub_tile, lane_extent),
                                   lambda i, j, prm: (i, j, 0)),
        ),
        compiler_params=pltpu.CompilerParams(
            dimension_semantics=("parallel", "parallel"),
            vmem_limit_bytes=_VMEM_LIMIT_BYTES),
        cost_estimate=pl.CostEstimate(flops=n * c * h * w,
                                      transcendentals=0,
                                      bytes_accessed=2 * nbytes),
    )
    return call, hf, hr


@functools.partial(jax.jit, static_argnames=("mode",))
def gridmask_apply(x, params_flat, *, mode):
    """x: (N, C, H, W); params_flat: (5*N,) int32 [d, st_h, st_w, l, skip]."""
    n, c, h, w = x.shape
    call, hf, hr = _build_gridmask_call(n, c, h, w, str(x.dtype), int(mode))
    out = call(params_flat, x.reshape(n, c * hf, hr * w))
    return out.reshape(n, c, h, w)


# ------------------------- Host-side parameter sampling ----------------------


class GridMask:
    """JAX/Pallas port of the PyTorch GridMask module (training-mode forward)."""

    def __init__(self, d1, d2, rotate=1, ratio=0.5, mode=0, prob=1.0, seed=0):
        self.d1 = d1
        self.d2 = d2
        self.rotate = rotate
        self.ratio = ratio
        self.mode = mode
        self.st_prob = self.prob = prob
        self.training = True
        self._rng = np.random.RandomState(seed)   # deterministic mask params
        self.last_params = None

    def set_prob(self, epoch, max_epoch):
        self.prob = self.st_prob * min(1, epoch / max_epoch)

    def _sample_params(self):
        """Per-sample scalars [d, st_h, st_w, l, skip] (host RNG only)."""
        if self._rng.rand() > self.prob:
            return (1, 0, 0, 0, 1)          # identity mask (prob skip)
        d = int(self._rng.randint(self.d1, self.d2))
        l = int(math.ceil(d * self.ratio))
        st_h = int(self._rng.randint(d))
        st_w = int(self._rng.randint(d))
        r = int(self._rng.randint(self.rotate))
        # TODO(synk): PIL mask.rotate(r) for r > 0 has no clean Pallas/JAX
        # equivalent; only r == 0 (the default rotate=1) is reproduced.
        del r
        return (d, st_h, st_w, l, 0)

    def __call__(self, x):
        if not self.training:
            return x
        n = x.shape[0]
        params = np.array([self._sample_params() for _ in range(n)], np.int32)
        self.last_params = params
        return gridmask_apply(x, jnp.asarray(params.reshape(-1)),
                              mode=self.mode)


# -------------------- Loop-based numpy reference (for checking) --------------


def _reference_mask_np(h, w, d, st_h, st_w, l, skip, mode):
    """Reproduces the original Grid.__call__ mask construction (no rotation)."""
    d, st_h, st_w, l, skip = int(d), int(st_h), int(st_w), int(l), int(skip)
    if skip:
        return np.ones((h, w), np.float32)
    hh = math.ceil(math.sqrt(h * h + w * w))
    mask = np.ones((hh, hh), np.float32)
    for i in range(-1, hh // d + 1):
        s = max(min(d * i + st_h, hh), 0)
        t = max(min(d * i + st_h + l, hh), 0)
        mask[s:t, :] = 0
    for i in range(-1, hh // d + 1):
        s = max(min(d * i + st_w, hh), 0)
        t = max(min(d * i + st_w + l, hh), 0)
        mask[:, s:t] = 0
    mask = mask[(hh - h) // 2:(hh - h) // 2 + h,
                (hh - w) // 2:(hh - w) // 2 + w]
    if mode == 1:
        mask = 1 - mask
    return mask.astype(np.float32)


# ---------------------------------- main -------------------------------------


if __name__ == "__main__":
    key = jax.random.PRNGKey(0)
    n, c, h, w = 2, 4, 16, 16
    x = jax.random.normal(key, (n, c, h, w), dtype=jnp.float32)
    x_np = np.asarray(x)

    for mode in (0, 1):
        gm = GridMask(d1=2, d2=8, rotate=1, ratio=0.5, mode=mode, prob=1.0,
                      seed=mode)
        out = jax.block_until_ready(gm(x))
        assert out.shape == (n, c, h, w) and out.dtype == jnp.float32

        # Self-check: kernel output vs. the original loop-based construction.
        masks = np.stack([
            _reference_mask_np(h, w, *gm.last_params[i], mode=gm.mode)
            for i in range(n)
        ], axis=0)
        expected = x_np * masks[:, None, :, :]
        np.testing.assert_allclose(np.asarray(out), expected, rtol=0, atol=1e-6)

    print("KERNEL_OK")
</pallas_src>

<mosaic_0001>
module attributes {stable_mosaic.version = 11 : i64} {
  func.func @_gridmask_kernel(%arg0: i32, %arg1: i32, %arg2: memref<10xi32, #tpu.memory_space<smem>>, %arg3: memref<1x8x128xf32, #tpu.memory_space<vmem>>, %arg4: memref<1x8x128xf32, #tpu.memory_space<vmem>>) attributes {dimension_semantics = [#tpu.dimension_semantics<parallel>, #tpu.dimension_semantics<parallel>], iteration_bounds = array<i64: 2, 1>, scalar_prefetch = 1 : i64, scratch_operands = 0 : i64, tpu.core_type = #tpu.core_type<tc>, window_params = [{transform_indices = @transform_0, window_bounds = array<i64: 1, 8, 128>}, {transform_indices = @transform_1, window_bounds = array<i64: 1, 8, 128>}]} {
    %c5_i32 = arith.constant 5 : i32
    %0 = arith.muli %arg0, %c5_i32 : i32
    %1 = arith.index_cast %0 : i32 to index
    %2 = memref.load %arg2[%1] : memref<10xi32, #tpu.memory_space<smem>>
    %c1_i32 = arith.constant 1 : i32
    %3 = arith.addi %0, %c1_i32 : i32
    %4 = arith.index_cast %3 : i32 to index
    %5 = memref.load %arg2[%4] : memref<10xi32, #tpu.memory_space<smem>>
    %c2_i32 = arith.constant 2 : i32
    %6 = arith.addi %0, %c2_i32 : i32
    %7 = arith.index_cast %6 : i32 to index
    %8 = memref.load %arg2[%7] : memref<10xi32, #tpu.memory_space<smem>>
    %c3_i32 = arith.constant 3 : i32
    %9 = arith.addi %0, %c3_i32 : i32
    %10 = arith.index_cast %9 : i32 to index
    %11 = memref.load %arg2[%10] : memref<10xi32, #tpu.memory_space<smem>>
    %c4_i32 = arith.constant 4 : i32
    %12 = arith.addi %0, %c4_i32 : i32
    %13 = arith.index_cast %12 : i32 to index
    %14 = memref.load %arg2[%13] : memref<10xi32, #tpu.memory_space<smem>>
    %15 = arith.sitofp %2 : i32 to f32
    %16 = arith.sitofp %11 : i32 to f32
    %17 = arith.sitofp %5 : i32 to f32
    %18 = arith.sitofp %8 : i32 to f32
    %19 = tpu.iota {dimensions = array<i32: 1>} : vector<1x8x1xi32>
    %20 = arith.sitofp %19 : vector<1x8x1xi32> to vector<1x8x1xf32>
    %c8_i32 = arith.constant 8 : i32
    %21 = arith.muli %arg1, %c8_i32 : i32
    %22 = arith.sitofp %21 : i32 to f32
    %23 = vector.broadcast %22 : f32 to vector<1x8x1xf32>
    %24 = arith.addf %23, %20 : vector<1x8x1xf32>
    %cst = arith.constant 5.000000e-01 : f32
    %25 = vector.broadcast %cst : f32 to vector<1x8x1xf32>
    %26 = arith.addf %24, %25 : vector<1x8x1xf32>
    %cst_0 = arith.constant 2.000000e+00 : f32
    %27 = vector.broadcast %cst_0 : f32 to vector<1x8x1xf32>
    %28 = arith.divf %26, %27 : vector<1x8x1xf32>
    %29 = math.floor %28 : vector<1x8x1xf32>
    %cst_1 = arith.constant 2.000000e+00 : f32
    %30 = vector.broadcast %cst_1 : f32 to vector<1x8x1xf32>
    %31 = arith.mulf %29, %30 : vector<1x8x1xf32>
    %32 = arith.subf %24, %31 : vector<1x8x1xf32>
    %cst_2 = arith.constant 8.000000e+00 : f32
    %33 = vector.broadcast %cst_2 : f32 to vector<1x8x1xf32>
    %34 = arith.mulf %32, %33 : vector<1x8x1xf32>
    %cst_3 = arith.constant 3.000000e+00 : f32
    %35 = vector.broadcast %cst_3 : f32 to vector<1x8x1xf32>
    %36 = arith.addf %34, %35 : vector<1x8x1xf32>
    %37 = vector.broadcast %15 : f32 to vector<1x8x1xf32>
    %38 = arith.addf %36, %37 : vector<1x8x1xf32>
    %39 = vector.broadcast %17 : f32 to vector<1x8x1xf32>
    %40 = arith.subf %38, %39 : vector<1x8x1xf32>
    %cst_4 = arith.constant 5.000000e-01 : f32
    %41 = vector.broadcast %cst_4 : f32 to vector<1x8x1xf32>
    %42 = arith.addf %40, %41 : vector<1x8x1xf32>
    %43 = vector.broadcast %15 : f32 to vector<1x8x1xf32>
    %44 = arith.divf %42, %43 : vector<1x8x1xf32>
    %45 = math.floor %44 : vector<1x8x1xf32>
    %46 = vector.broadcast %15 : f32 to vector<1x8x1xf32>
    %47 = arith.mulf %45, %46 : vector<1x8x1xf32>
    %48 = arith.subf %40, %47 : vector<1x8x1xf32>
    %49 = tpu.iota {dimensions = array<i32: 2>} : vector<1x1x128xi32>
    %50 = arith.sitofp %49 : vector<1x1x128xi32> to vector<1x1x128xf32>
    %cst_5 = arith.constant 5.000000e-01 : f32
    %51 = vector.broadcast %cst_5 : f32 to vector<1x1x128xf32>
    %52 = arith.addf %50, %51 : vector<1x1x128xf32>
    %cst_6 = arith.constant 1.600000e+01 : f32
    %53 = vector.broadcast %cst_6 : f32 to vector<1x1x128xf32>
    %54 = arith.divf %52, %53 : vector<1x1x128xf32>
    %55 = math.floor %54 : vector<1x1x128xf32>
    %cst_7 = arith.constant 1.600000e+01 : f32
    %56 = vector.broadcast %cst_7 : f32 to vector<1x1x128xf32>
    %57 = arith.mulf %55, %56 : vector<1x1x128xf32>
    %58 = arith.subf %50, %57 : vector<1x1x128xf32>
    %cst_8 = arith.constant 5.000000e-01 : f32
    %59 = vector.broadcast %cst_8 : f32 to vector<1x1x128xf32>
    %60 = arith.addf %55, %59 : vector<1x1x128xf32>
    %61 = vector.broadcast %15 : f32 to vector<1x1x128xf32>
    %62 = arith.divf %60, %61 : vector<1x1x128xf32>
    %63 = math.floor %62 : vector<1x1x128xf32>
    %64 = vector.broadcast %15 : f32 to vector<1x1x128xf32>
    %65 = arith.mulf %63, %64 : vector<1x1x128xf32>
    %66 = arith.subf %55, %65 : vector<1x1x128xf32>
    %cst_9 = arith.constant 3.000000e+00 : f32
    %67 = vector.broadcast %cst_9 : f32 to vector<1x1x128xf32>
    %68 = arith.addf %58, %67 : vector<1x1x128xf32>
    %69 = vector.broadcast %15 : f32 to vector<1x1x128xf32>
    %70 = arith.addf %68, %69 : vector<1x1x128xf32>
    %71 = vector.broadcast %18 : f32 to vector<1x1x128xf32>
    %72 = arith.subf %70, %71 : vector<1x1x128xf32>
    %cst_10 = arith.constant 5.000000e-01 : f32
    %73 = vector.broadcast %cst_10 : f32 to vector<1x1x128xf32>
    %74 = arith.addf %72, %73 : vector<1x1x128xf32>
    %75 = vector.broadcast %15 : f32 to vector<1x1x128xf32>
    %76 = arith.divf %74, %75 : vector<1x1x128xf32>
    %77 = math.floor %76 : vector<1x1x128xf32>
    %78 = vector.broadcast %15 : f32 to vector<1x1x128xf32>
    %79 = arith.mulf %77, %78 : vector<1x1x128xf32>
    %80 = arith.subf %72, %79 : vector<1x1x128xf32>
    %81 = vector.broadcast %16 : f32 to vector<1x1x128xf32>
    %82 = arith.cmpf olt, %80, %81 : vector<1x1x128xf32>
    %83 = vector.broadcast %48 : vector<1x8x1xf32> to vector<1x8x128xf32>
    %84 = vector.broadcast %66 : vector<1x1x128xf32> to vector<1x8x128xf32>
    %85 = arith.addf %83, %84 : vector<1x8x128xf32>
    %86 = vector.broadcast %15 : f32 to vector<1x8x128xf32>
    %87 = arith.cmpf oge, %85, %86 : vector<1x8x128xf32>
    %88 = vector.broadcast %15 : f32 to vector<1x8x128xf32>
    %89 = arith.subf %85, %88 : vector<1x8x128xf32>
    %90 = arith.select %87, %89, %85 : vector<1x8x128xi1>, vector<1x8x128xf32>
    %91 = vector.broadcast %16 : f32 to vector<1x8x128xf32>
    %92 = arith.cmpf olt, %90, %91 : vector<1x8x128xf32>
    %93 = vector.broadcast %82 : vector<1x1x128xi1> to vector<1x8x128xi1>
    %94 = arith.ori %92, %93 : vector<1x8x128xi1>
    %cst_11 = arith.constant dense<true> : vector<1x8x128xi1>
    %95 = arith.xori %94, %cst_11 : vector<1x8x128xi1>
    %96 = arith.extui %95 : vector<1x8x128xi1> to vector<1x8x128xi32>
    %97 = arith.sitofp %96 : vector<1x8x128xi32> to vector<1x8x128xf32>
    %c0_i32 = arith.constant 0 : i32
    %98 = arith.cmpi ne, %14, %c0_i32 : i32
    %cst_12 = arith.constant 1.000000e+00 : f32
    %99 = vector.broadcast %cst_12 : f32 to vector<1x8x128xf32>
    %100 = arith.select %98, %99, %97 : vector<1x8x128xf32>
    %c0 = arith.constant 0 : index
    %c0_13 = arith.constant 0 : index
    %c0_14 = arith.constant 0 : index
    %101 = vector.load %arg3[%c0, %c0_13, %c0_14] : memref<1x8x128xf32, #tpu.memory_space<vmem>>, vector<1x8x128xf32>
    %102 = arith.mulf %101, %100 : vector<1x8x128xf32>
    %c0_15 = arith.constant 0 : index
    %c0_16 = arith.constant 0 : index
    %c0_17 = arith.constant 0 : index
    %103 = vector.load %arg4[%c0_15, %c0_16, %c0_17] : memref<1x8x128xf32, #tpu.memory_space<vmem>>, vector<1x8x128xf32>
    tpu.vector_store %arg4[%c0_15, %c0_16, %c0_17], %102 {strides = array<i32>} : memref<1x8x128xf32, #tpu.memory_space<vmem>>, vector<1x8x128xf32>,
    return
  }
  func.func @transform_0(%arg0: i32, %arg1: i32, %arg2: memref<10xi32, #tpu.memory_space<smem>>) -> (i32, i32, i32) {
    %c0_i32 = arith.constant 0 : i32
    %c0_i32_0 = arith.constant 0 : i32
    return %arg0, %arg1, %c0_i32 : i32, i32, i32
  }
  func.func @transform_1(%arg0: i32, %arg1: i32, %arg2: memref<10xi32, #tpu.memory_space<smem>>) -> (i32, i32, i32) {
    %c0_i32 = arith.constant 0 : i32
    %c0_i32_0 = arith.constant 0 : i32
    return %arg0, %arg1, %c0_i32 : i32, i32, i32
  }
}

</mosaic_0001>

<bundles_post_ra>
// kernel: gridmask_apply.1
= control target key start
LH: loop header
LB: loop body
LE: loop exit
PB: predicated region body
PF: predicated region fallthrough
CT: control target
= control target key end

     0   :  { %s450_s0 = inlined_call_operand.vmem [shape: s32[10], index: 0, kind: input, shape index: {}]   ;;  %s451_s1 = inlined_call_operand.vmem [shape: f32[2,8,128], index: 1, kind: input, shape index: {}]   ;;  %s452_s2 = inlined_call_operand.vmem [shape: f32[2,8,128], index: 2, kind: output, shape index: {}]  }
   0x1   :  { %s7_s11 = sshll.u32 %s450_s0, 4  ;;  %s8_s11 = int_to_ptr.vmem [resolvable:$true] %s7_s11 }
   0x2   :  { %s346_s12 = scalar_lea.vmem %s8_s11, 16  ;;  %p351_p1 = scmp.lt.s32.totalorder %s8_s11, %s8_s11 }
   0x3   :  { %p347_p0 = scmp.ne.s32.totalorder %s8_s11, %s346_s12  ;;  %p352_p2 = scmp.lt.s32.totalorder %s346_s12, %s346_s12 }
   0x5   :  { %p353_p3 = por %p352_p2, %p351_p1 }
   0x7   :  { %p354_p4 = pnand %p353_p3, %p347_p0 }
   0x9   :  { %357 = shalt.err (!%p354_p4)  }
   0xa   :  { %s384_s13 = smov [#allocation3]  }
   0xb   :  { %10 = dma.vmem_to_smem %s8_s11, 16, %s384_s13, [#allocation2] }
   0xc   :  { %370 = dma.done.wait [#allocation2], 16 }
   0xd   :  { %371 = vsyncadd [#allocation2], 4294967280 }
   0xe   :  { %12 = sfence }
   0xf   :  { %s405_s14 = smov 0   ;;  %s407_s15 = smov 0  }
  0x10   :  { %s409_s16 = smov 0  }
  0x11 LB: > { %s30_s0 = sadd.s32 1, %s378_s15  ;;  %p311_p5 = scmp.ge.s32.totalorder %s382_s16, 1  ;;  %s382_s16 = sphi %s409_s16, %s18_s16   ;;  %s378_s15 = sphi %s407_s15, %s454_s15   ;;  %s374_s14 = sphi %s405_s14, %s453_s14  }
  0x12   : > { %p32_p6 = scmp.ge.s32.totalorder %s30_s0, 2  ;;  %p112_p7 = scmp.lt.s32.totalorder %s382_s16, 3 }
  0x14   : > { %s456_s0 = smov (%p32_p6, %s30_s0), 0  ;;  %p113_p8 = pnand %p311_p5, %p112_p7 }
  0x15   : > { %s426_s17 = smul.u32 (!%p113_p8), 5, %s374_s14  ;;  %p136_p9 = scmp.lt.s32.totalorder (!%p113_p8), %s374_s14, 1 }
  0x16   : > { %116 = sbr.rel (%p113_p8) target bundleno = 74 (0x4a), region = 24 }
  0x17   : > { %s151_s18 = sld [smem:[#allocation3 + %s426_s17]] (!%p113_p8)  ;;  %s152_s19 = sadd.s32 (!%p113_p8), 1, %s426_s17 }
  0x18   : > { %s153_s20 = sld [smem:[#allocation3 + %s152_s19]] (!%p113_p8)  ;;  %s154_s21 = sadd.s32 (!%p113_p8), 2, %s426_s17 }
  0x19   : > { %s155_s22 = sld [smem:[#allocation3 + %s154_s21]] (!%p113_p8)  ;;  %s158_s26 = sadd.s32 (!%p113_p8), 4, %s426_s17 }
  0x1a   : > { %s156_s27 = sadd.s32 (!%p113_p8), 3, %s426_s17  ;;  %s159_s28 = sld [smem:[#allocation3 + %s158_s26]] (!%p113_p8) }
  0x1b   : > { %v164_v0 = vlaneseq  ;;  %s157_s29 = sld [smem:[#allocation3 + %s156_s27]]  ;;  %s458_s14 = smov (!%p136_p9, %s374_s14), 1  ;;  %vm385_vm5 = vmmov 1   ;;  %v386_v47 = vmov 0.0  }
  0x1c   : > { %s312_s4 = sshll.u32 %s458_s14, 3 }
  0x1d   : > { %v165_v1 = vshrl.u32 %v164_v0, 7  ;;  %v190_v2 = vand.u32 127, %v164_v0  ;;  %s160_s23 = scvt.s32.f32 %s151_s18  ;;  %s142_s7 = scalar_lea.vmem %s451_s1, %s312_s4 }
  0x1e   : > { %s162_s25 = scvt.s32.f32 %s153_s20  ;;  %v230_v46 = vld [vmem:[%s142_s7] sm:$0xff]  ;;  %s149_s10 = scalar_lea.vmem %s452_s2, %s312_s4 }
  0x1f   : > { %v166_v3 = vcvt.s32.f32 %v165_v1  ;;  %v191_v4 = vcvt.s32.f32 %v190_v2  ;;  %v179_v11 = vstv %s160_s23  ;;  %s163_s24 = scvt.s32.f32 %s155_s22 }
  0x20   : > { %344 = vrcp.f32 %v179_v11  ;;  %v181_v21 = vstv %s162_s25  ;;  %p225_p10 = scmp.ne.s32.totalorder %s159_s28, 0 }
  0x21   : > { %v171_v5 = vadd.f32 0.5, %v166_v3  ;;  %v192_v6 = vadd.f32 0.5, %v191_v4  ;;  %v205_v18 = vstv %s163_s24  ;;  %s161_s30 = scvt.s32.f32 %s157_s29 }
  0x22   : > { %s226_s3 = scalar_select %p225_p10, 1, 0 }
  0x23   : > { %v173_v7 = vmul.f32 0.5, %v171_v5  ;;  %v194_v8 = vmul.f32 0.0625, %v192_v6  ;;  %v212_v41 = vstv %s161_s30 }
  0x24   : > { %v227_v44 = vstv %s226_s3 }
  0x25   : > { %v174_v9 = vfloor.f32 %v173_v7  ;;  %v195_v10 = vfloor.f32 %v194_v8  ;;  %vm228_vm4 = vcmp.eq.s32.totalorder %v227_v44, 1 }
  0x27   : > { %v175_v12 = vmul.f32 2.0, %v174_v9  ;;  %v196_v13 = vmul.f32 16.0, %v195_v10  ;;  %v198_v25 = vadd.f32 0.5, %v195_v10 }
  0x29   : > { %v176_v14 = vsub.f32 %v166_v3, %v175_v12  ;;  %v197_v15 = vsub.f32 %v191_v4, %v196_v13 }
  0x2b   : > { %v177_v16 = vmul.f32 8.0, %v176_v14  ;;  %v203_v17 = vadd.f32 3.0, %v197_v15 }
  0x2d   : > { %v178_v19 = vadd.f32 3.0, %v177_v16  ;;  %v204_v20 = vadd.f32 %v203_v17, %v179_v11  ;;  %v345_v28 = vpop.eup %344 }
  0x2e   : > { %v199_v30 = vmul.f32 %v345_v28, %v198_v25 }
  0x2f   : > { %v180_v22 = vadd.f32 %v179_v11, %v178_v19  ;;  %v206_v23 = vsub.f32 %v204_v20, %v205_v18 }
  0x30   : > { %v200_v33 = vfloor.f32 %v199_v30 }
  0x31   : > { %v182_v24 = vsub.f32 %v180_v22, %v181_v21  ;;  %v207_v26 = vadd.f32 0.5, %v206_v23 }
  0x32   : > { %v201_v36 = vmul.f32 %v200_v33, %v179_v11 }
  0x33   : > { %v183_v27 = vadd.f32 0.5, %v182_v24  ;;  %v208_v31 = vmul.f32 %v345_v28, %v207_v26 }
  0x34   : > { %v202_v39 = vsub.f32 %v195_v10, %v201_v36 }
  0x35   : > { %v185_v29 = vmul.f32 %v345_v28, %v183_v27  ;;  %v209_v34 = vfloor.f32 %v208_v31 }
  0x37   : > { %v186_v32 = vfloor.f32 %v185_v29  ;;  %v210_v37 = vmul.f32 %v209_v34, %v179_v11 }
  0x39   : > { %v187_v35 = vmul.f32 %v186_v32, %v179_v11  ;;  %v211_v40 = vsub.f32 %v206_v23, %v210_v37 }
  0x3b   : > { %v188_v38 = vsub.f32 %v182_v24, %v187_v35  ;;  %vm213_vm1 = vcmp.lt.f32.partialorder %v211_v40, %v212_v41 }
  0x3d   : > { %v214_v42 = vadd.f32 %v202_v39, %v188_v38 }
  0x3f   : > { %vm215_vm0 = vcmp.ge.f32.partialorder %v214_v42, %v179_v11  ;;  %v216_v43 = vsub.f32 %v214_v42, %v179_v11 }
  0x41   : > { %v217_v45 = vsel %vm215_vm0, %v216_v43, %v214_v42 }
  0x42   : > { %vm218_vm2 = vcmp.lt.f32.partialorder %v217_v45, %v212_v41 }
  0x43   : > { %vm221_vm3 = vmor %vm218_vm2, %vm213_vm1 }
  0x44   : > { %vm222_vm6 = vmxor %vm221_vm3, %vm385_vm5 }
  0x45   : > { %v314_v48 = vsel %vm222_vm6, 1.0, %v386_v47 }
  0x46   : > { %v229_v49 = vsel %vm228_vm4, 1.0, %v314_v48 }
  0x47   : > { %v231_v50 = vmul.f32 %v230_v46, %v229_v49 }
  0x49   : > { %232 = vst [vmem:[%s149_s10] sm:$0xff] %v231_v50 }
  0x4a PF: > { %s18_s16 = sadd.s32 1, %s382_s16   ;;  %s453_s14 = smov %s378_s15 }
  0x4b   : > { %p15_p11 = scmp.ge.s32.totalorder %s18_s16, 4   ;;  %s454_s15 = smov %s456_s0 }
  0x4d   :  { %17 = sbr.rel (!%p15_p11) target bundleno = 17 (0x11), region = 54 }

</bundles_post_ra>
